<compile_context>
chip_gen: v7x
topology: tpu7x:2x2x1
jax: 0.10.0
libtpu: 0.0.40
codegen_flags: <defaults>
</compile_context>

<pallas_src>
import numpy as np
import jax
import jax.numpy as jnp
from jax.experimental import pallas as pl
from jax.experimental.pallas import tpu as pltpu

_LANE = 128
_SUB = 8


def _round_up(x, m):
    return ((x + m - 1) // m) * m


def decoder_kernel(x_ref, w1_ref, b1_ref, w2_ref, b2_ref, w3_ref, b3_ref, mean_ref):
    """Linear -> ReLU -> Linear -> ReLU -> Linear -> Sigmoid for one batch tile.

    MXU matmuls take bf16 operands with f32 accumulation.  Hidden epilogues
    (bias add + ReLU) run in the dtype the biases were supplied in (bf16 on
    v6e/v7x, f32 on v5e).  The final bias add + sigmoid run in f32; the sigmoid
    uses exp(-x) and an approximate reciprocal so both hit the EUP slot.
    """
    x = x_ref[...]                                               # bf16 tile

    h1 = jnp.dot(x, w1_ref[...], preferred_element_type=jnp.float32)
    h1 = jnp.maximum(h1.astype(b1_ref.dtype) + b1_ref[...], 0).astype(jnp.bfloat16)

    h2 = jnp.dot(h1, w2_ref[...], preferred_element_type=jnp.float32)
    h2 = jnp.maximum(h2.astype(b2_ref.dtype) + b2_ref[...], 0).astype(jnp.bfloat16)

    out = jnp.dot(h2, w3_ref[...], preferred_element_type=jnp.float32) + b3_ref[...]

    # Featurewise activation: continuous & binary columns -> Sigmoid.
    mean_ref[...] = pl.reciprocal(1.0 + jnp.exp(-out), approx=True).astype(mean_ref.dtype)


def _supports_bf16_valu():
    """v5e (and older) TensorCores have no bf16 VALU -> keep f32 epilogues there."""
    try:
        kind = jax.devices()[0].device_kind.lower()
    except Exception:
        return True
    return not any(tag in kind for tag in ("v2", "v3", "v4", "v5"))


def _const_spec(shape):
    """Full-array spec for grid-invariant weights/biases, single-buffered."""
    index_map = lambda i: (0, 0)
    try:
        return pl.BlockSpec(shape, index_map, pipeline_mode=pl.Buffered(1))
    except TypeError:  # older jax without pipeline_mode: fall back to default buffering
        return pl.BlockSpec(shape, index_map)


def decoder_forward(latent_sample, params, variance, *, max_tile_m=256):
    """Decoder.forward: returns (mean, logvar), each (batch, output_dim), f32."""
    w1, b1, w2, b2, w3, b3 = params
    B, in_dim = latent_sample.shape
    h1_dim, h2_dim, out_dim = w1.shape[1], w2.shape[1], w3.shape[1]

    # Lane-dense padding of HIDDEN widths only (exact: zero weight columns with
    # zero bias stay zero through ReLU and contribute nothing downstream).
    # The output dim is NOT padded, so mean writeback is not inflated.
    h1p = _round_up(h1_dim, _LANE)
    h2p = _round_up(h2_dim, _LANE)

    ep_dtype = jnp.bfloat16 if _supports_bf16_valu() else jnp.float32

    def pad2(a, rows, cols):
        return jnp.pad(a, ((0, rows - a.shape[0]), (0, cols - a.shape[1])))

    w1p = pad2(w1, in_dim, h1p).astype(jnp.bfloat16)
    b1p = pad2(b1, 1, h1p).astype(ep_dtype)
    w2p = pad2(w2, h1p, h2p).astype(jnp.bfloat16)
    b2p = pad2(b2, 1, h2p).astype(ep_dtype)
    w3p = pad2(w3, h2p, out_dim).astype(jnp.bfloat16)
    b3p = b3.astype(jnp.float32)

    # Batch tiling: cap tile_m (vreg-spill ceiling ~256) and guarantee >= 2 grid
    # steps for B >= 16 so both v7x TensorCores get work; the extra grid step is
    # ~0.35 us on 1-TC chips (v5e/v6e), i.e. negligible.
    if B < 16:
        tile_m = _round_up(B, _SUB)
    else:
        n_tiles = max(2, pl.cdiv(B, max_tile_m))
        tile_m = _round_up(pl.cdiv(B, n_tiles), _SUB)
    tile_m = min(tile_m, _round_up(max_tile_m, _SUB))
    Bp = _round_up(B, tile_m)

    x = latent_sample.astype(jnp.bfloat16)       # halve x DMA; MXU wants bf16 anyway
    if Bp != B:
        x = jnp.pad(x, ((0, Bp - B), (0, 0)))
    grid = (Bp // tile_m,)

    # VMEM budget: 1x single-buffered weights + 2x double-buffered x/mean tiles
    # + f32 intermediates, with 2x headroom; clamped to [32, 64] MiB so it is
    # valid from v5e (16 MiB scoped default) through v7x (64 MiB physical).
    def nbytes(shape, dtype):
        return int(np.prod(shape)) * np.dtype(dtype).itemsize

    est = (nbytes((in_dim, h1p), jnp.bfloat16)
           + nbytes((h1p, h2p), jnp.bfloat16)
           + nbytes((h2p, out_dim), jnp.bfloat16)
           + nbytes((1, h1p), ep_dtype) + nbytes((1, h2p), ep_dtype)
           + nbytes((1, out_dim), jnp.float32)
           + 2 * (nbytes((tile_m, in_dim), jnp.bfloat16)
                  + nbytes((tile_m, out_dim), jnp.float32))
           + nbytes((tile_m, h1p), jnp.float32)
           + nbytes((tile_m, h2p), jnp.float32)
           + 2 * nbytes((tile_m, out_dim), jnp.float32))
    vmem_limit = int(min(64 << 20, max(32 << 20, 2 * est)))

    mean_p = pl.pallas_call(
        decoder_kernel,
        out_shape=jax.ShapeDtypeStruct((Bp, out_dim), jnp.float32),
        grid_spec=pltpu.PrefetchScalarGridSpec(
            num_scalar_prefetch=0,
            grid=grid,
            in_specs=[
                pl.BlockSpec((tile_m, in_dim), lambda i: (i, 0)),   # x tile
                _const_spec((in_dim, h1p)),                         # w1
                _const_spec((1, h1p)),                              # b1
                _const_spec((h1p, h2p)),                            # w2
                _const_spec((1, h2p)),                              # b2
                _const_spec((h2p, out_dim)),                        # w3
                _const_spec((1, out_dim)),                          # b3
            ],
            out_specs=pl.BlockSpec((tile_m, out_dim), lambda i: (i, 0)),  # mean
        ),
        compiler_params=pltpu.CompilerParams(
            dimension_semantics=("parallel",),
            vmem_limit_bytes=vmem_limit),
    )(x, w1p, b1p, w2p, b2p, w3p, b3p)

    mean = mean_p if Bp == B else mean_p[:B]
    # logvar is a compile-time constant; build it in the wrapper rather than
    # writing it back from the kernel (halves output HBM writeback).
    logvar = jnp.full((B, out_dim), float(np.log(variance)), dtype=jnp.float32)
    return mean, logvar


def init_params(key, input_dim, hidden_dims, output_dim):
    """Deterministic parameter init (stand-in for generate_fully_connected)."""
    dims = [input_dim] + list(hidden_dims) + [output_dim]
    params = []
    for layer_idx in range(len(dims) - 1):
        fan_in, fan_out = dims[layer_idx], dims[layer_idx + 1]
        key, wk, bk = jax.random.split(key, 3)
        bound = 1.0 / np.sqrt(fan_in)
        # stored as (in, out); PyTorch Linear weight is (out, in) -> transposed here
        w = jax.random.uniform(wk, (fan_in, fan_out), jnp.float32, -bound, bound)
        b = jax.random.uniform(bk, (1, fan_out), jnp.float32, -bound, bound)
        params.extend([w, b])
    return tuple(params)


def reference_forward(latent_sample, params, variance):
    """Pure-JAX f32 reference for correctness checking."""
    w1, b1, w2, b2, w3, b3 = params
    h = jnp.maximum(latent_sample @ w1 + b1, 0.0)
    h = jnp.maximum(h @ w2 + b2, 0.0)
    out = h @ w3 + b3
    mean = jax.nn.sigmoid(out)
    logvar = jnp.full_like(mean, np.log(variance))
    return mean, logvar


if __name__ == "__main__":
    # Small shapes consistent with the module's forward pass.
    batch_size = 16
    input_dim = 8          # latent dim
    hidden_dims = [32, 32]
    output_dim = 16        # e.g. 10 continuous + 6 binary processed columns
    variance = 0.1

    key = jax.random.PRNGKey(0)
    key, xkey = jax.random.split(key)
    latent_sample = jax.random.normal(xkey, (batch_size, input_dim), jnp.float32)
    params = init_params(key, input_dim, hidden_dims, output_dim)

    mean, logvar = decoder_forward(latent_sample, params, variance)
    jax.block_until_ready((mean, logvar))

    ref_mean, ref_logvar = reference_forward(latent_sample, params, variance)
    # bf16 MXU operands / bf16 epilogues / approx reciprocal introduce small
    # drift vs. the f32 reference (sigmoid output in [0,1], so atol dominates).
    np.testing.assert_allclose(np.asarray(mean), np.asarray(ref_mean),
                               rtol=2e-2, atol=2e-2)
    np.testing.assert_allclose(np.asarray(logvar), np.asarray(ref_logvar),
                               rtol=1e-6, atol=1e-6)
    assert mean.shape == (batch_size, output_dim)
    assert logvar.shape == (batch_size, output_dim)

    print("KERNEL_OK")
</pallas_src>

<mosaic_0001>
module attributes {stable_mosaic.version = 11 : i64} {
  func.func @decoder_kernel(%arg0: i32, %arg1: memref<8x8xbf16, #tpu.memory_space<vmem>>, %arg2: memref<8x128xbf16, #tpu.memory_space<vmem>>, %arg3: memref<1x128xbf16, #tpu.memory_space<vmem>>, %arg4: memref<128x128xbf16, #tpu.memory_space<vmem>>, %arg5: memref<1x128xbf16, #tpu.memory_space<vmem>>, %arg6: memref<128x16xbf16, #tpu.memory_space<vmem>>, %arg7: memref<1x16xf32, #tpu.memory_space<vmem>>, %arg8: memref<8x16xf32, #tpu.memory_space<vmem>>) attributes {dimension_semantics = [#tpu.dimension_semantics<parallel>], iteration_bounds = array<i64: 2>, scalar_prefetch = 0 : i64, scratch_operands = 0 : i64, tpu.core_type = #tpu.core_type<tc>, window_params = [{transform_indices = @transform_0, window_bounds = array<i64: 8, 8>}, {pipeline_mode = #tpu.pipeline_mode<synchronous>, transform_indices = @transform_1, window_bounds = array<i64: 8, 128>}, {pipeline_mode = #tpu.pipeline_mode<synchronous>, transform_indices = @transform_2, window_bounds = array<i64: 1, 128>}, {pipeline_mode = #tpu.pipeline_mode<synchronous>, transform_indices = @transform_3, window_bounds = array<i64: 128, 128>}, {pipeline_mode = #tpu.pipeline_mode<synchronous>, transform_indices = @transform_4, window_bounds = array<i64: 1, 128>}, {pipeline_mode = #tpu.pipeline_mode<synchronous>, transform_indices = @transform_5, window_bounds = array<i64: 128, 16>}, {pipeline_mode = #tpu.pipeline_mode<synchronous>, transform_indices = @transform_6, window_bounds = array<i64: 1, 16>}, {transform_indices = @transform_7, window_bounds = array<i64: 8, 16>}]} {
    %c0 = arith.constant 0 : index
    %c0_0 = arith.constant 0 : index
    %0 = vector.load %arg1[%c0, %c0_0] : memref<8x8xbf16, #tpu.memory_space<vmem>>, vector<8x8xbf16>
    %c0_1 = arith.constant 0 : index
    %c0_2 = arith.constant 0 : index
    %1 = vector.load %arg2[%c0_1, %c0_2] : memref<8x128xbf16, #tpu.memory_space<vmem>>, vector<8x128xbf16>
    %cst = arith.constant dense<0.000000e+00> : vector<8x128xf32>
    %2 = tpu.matmul %0, %1, %cst {dimension_numbers = #tpu.dot_dimension_numbers<[1], [0], [0], [1], [0, 0, 1, 1], [], []>} : vector<8x8xbf16>, vector<8x128xbf16>, vector<8x128xf32> -> vector<8x128xf32>
    %3 = arith.truncf %2 : vector<8x128xf32> to vector<8x128xbf16>
    %c0_3 = arith.constant 0 : index
    %c0_4 = arith.constant 0 : index
    %4 = vector.load %arg3[%c0_3, %c0_4] : memref<1x128xbf16, #tpu.memory_space<vmem>>, vector<1x128xbf16>
    %5 = vector.broadcast %4 : vector<1x128xbf16> to vector<8x128xbf16>
    %6 = arith.addf %3, %5 : vector<8x128xbf16>
    %cst_5 = arith.constant 0.000000e+00 : bf16
    %7 = vector.broadcast %cst_5 : bf16 to vector<8x128xbf16>
    %8 = arith.maximumf %6, %7 : vector<8x128xbf16>
    %c0_6 = arith.constant 0 : index
    %c0_7 = arith.constant 0 : index
    %9 = vector.load %arg4[%c0_6, %c0_7] : memref<128x128xbf16, #tpu.memory_space<vmem>>, vector<128x128xbf16>
    %cst_8 = arith.constant dense<0.000000e+00> : vector<8x128xf32>
    %10 = tpu.matmul %8, %9, %cst_8 {dimension_numbers = #tpu.dot_dimension_numbers<[1], [0], [0], [1], [0, 0, 1, 1], [], []>} : vector<8x128xbf16>, vector<128x128xbf16>, vector<8x128xf32> -> vector<8x128xf32>
    %11 = arith.truncf %10 : vector<8x128xf32> to vector<8x128xbf16>
    %c0_9 = arith.constant 0 : index
    %c0_10 = arith.constant 0 : index
    %12 = vector.load %arg5[%c0_9, %c0_10] : memref<1x128xbf16, #tpu.memory_space<vmem>>, vector<1x128xbf16>
    %13 = vector.broadcast %12 : vector<1x128xbf16> to vector<8x128xbf16>
    %14 = arith.addf %11, %13 : vector<8x128xbf16>
    %cst_11 = arith.constant 0.000000e+00 : bf16
    %15 = vector.broadcast %cst_11 : bf16 to vector<8x128xbf16>
    %16 = arith.maximumf %14, %15 : vector<8x128xbf16>
    %c0_12 = arith.constant 0 : index
    %c0_13 = arith.constant 0 : index
    %17 = vector.load %arg6[%c0_12, %c0_13] : memref<128x16xbf16, #tpu.memory_space<vmem>>, vector<128x16xbf16>
    %cst_14 = arith.constant dense<0.000000e+00> : vector<8x16xf32>
    %18 = tpu.matmul %16, %17, %cst_14 {dimension_numbers = #tpu.dot_dimension_numbers<[1], [0], [0], [1], [0, 0, 1, 1], [], []>} : vector<8x128xbf16>, vector<128x16xbf16>, vector<8x16xf32> -> vector<8x16xf32>
    %c0_15 = arith.constant 0 : index
    %c0_16 = arith.constant 0 : index
    %19 = vector.load %arg7[%c0_15, %c0_16] : memref<1x16xf32, #tpu.memory_space<vmem>>, vector<1x16xf32>
    %20 = vector.broadcast %19 : vector<1x16xf32> to vector<8x16xf32>
    %21 = arith.addf %18, %20 : vector<8x16xf32>
    %cst_17 = arith.constant 0.000000e+00 : f32
    %22 = vector.broadcast %cst_17 : f32 to vector<8x16xf32>
    %23 = arith.subf %22, %21 : vector<8x16xf32>
    %24 = math.exp %23 : vector<8x16xf32>
    %cst_18 = arith.constant 1.000000e+00 : f32
    %25 = vector.broadcast %cst_18 : f32 to vector<8x16xf32>
    %26 = arith.addf %25, %24 : vector<8x16xf32>
    %27 = tpu.reciprocal %26 {approx = true} : vector<8x16xf32> -> vector<8x16xf32>
    %c0_19 = arith.constant 0 : index
    %c0_20 = arith.constant 0 : index
    %28 = vector.load %arg8[%c0_19, %c0_20] : memref<8x16xf32, #tpu.memory_space<vmem>>, vector<8x16xf32>
    tpu.vector_store %arg8[%c0_19, %c0_20], %27 {strides = array<i32>} : memref<8x16xf32, #tpu.memory_space<vmem>>, vector<8x16xf32>,
    return
  }
  func.func @transform_0(%arg0: i32) -> (i32, i32) {
    %c0_i32 = arith.constant 0 : i32
    %c0_i32_0 = arith.constant 0 : i32
    return %arg0, %c0_i32 : i32, i32
  }
  func.func @transform_1(%arg0: i32) -> (i32, i32) {
    %c0_i32 = arith.constant 0 : i32
    %c0_i32_0 = arith.constant 0 : i32
    %c0_i32_1 = arith.constant 0 : i32
    return %c0_i32, %c0_i32_0 : i32, i32
  }
  func.func @transform_2(%arg0: i32) -> (i32, i32) {
    %c0_i32 = arith.constant 0 : i32
    %c0_i32_0 = arith.constant 0 : i32
    %c0_i32_1 = arith.constant 0 : i32
    return %c0_i32, %c0_i32_0 : i32, i32
  }
  func.func @transform_3(%arg0: i32) -> (i32, i32) {
    %c0_i32 = arith.constant 0 : i32
    %c0_i32_0 = arith.constant 0 : i32
    %c0_i32_1 = arith.constant 0 : i32
    return %c0_i32, %c0_i32_0 : i32, i32
  }
  func.func @transform_4(%arg0: i32) -> (i32, i32) {
    %c0_i32 = arith.constant 0 : i32
    %c0_i32_0 = arith.constant 0 : i32
    %c0_i32_1 = arith.constant 0 : i32
    return %c0_i32, %c0_i32_0 : i32, i32
  }
  func.func @transform_5(%arg0: i32) -> (i32, i32) {
    %c0_i32 = arith.constant 0 : i32
    %c0_i32_0 = arith.constant 0 : i32
    %c0_i32_1 = arith.constant 0 : i32
    return %c0_i32, %c0_i32_0 : i32, i32
  }
  func.func @transform_6(%arg0: i32) -> (i32, i32) {
    %c0_i32 = arith.constant 0 : i32
    %c0_i32_0 = arith.constant 0 : i32
    %c0_i32_1 = arith.constant 0 : i32
    return %c0_i32, %c0_i32_0 : i32, i32
  }
  func.func @transform_7(%arg0: i32) -> (i32, i32) {
    %c0_i32 = arith.constant 0 : i32
    %c0_i32_0 = arith.constant 0 : i32
    return %arg0, %c0_i32 : i32, i32
  }
}

</mosaic_0001>

<bundles_post_ra>
// kernel: tpu_custom_call.1
= control target key start
LH: loop header
LB: loop body
LE: loop exit
PB: predicated region body
PF: predicated region fallthrough
CT: control target
= control target key end

     0   :  { %12 = vsyncpa [#allocation3], 0  ;;  %s1089_s0 = inlined_call_operand.vmem [shape: bf16[16,8], index: 0, kind: input, shape index: {}]   ;;  %s1090_s1 = inlined_call_operand.vmem [shape: bf16[8,128], index: 1, kind: input, shape index: {}]   ;;  %s1091_s2 = inlined_call_operand.vmem [shape: bf16[1,128], index: 2, kind: input, shape index: {}]   ;;  %s1092_s3 = inlined_call_operand.vmem [shape: bf16[128,128], index: 3, kind: input, shape index: {}]   ;;  %s1093_s4 = inlined_call_operand.vmem [shape: bf16[1,128], index: 4, kind: input, shape index: {}]   ;;  %s1094_s5 = inlined_call_operand.vmem [shape: bf16[128,16], index: 5, kind: input, shape index: {}]   ;;  %s1095_s6 = inlined_call_operand.vmem [shape: f32[1,16], index: 6, kind: input, shape index: {}]   ;;  %s1096_s7 = inlined_call_operand.hbm [shape: f32[16,16], index: 7, kind: output, shape index: {}]  }
   0x1   :  { %14 = vsyncpa [#allocation3 + $0x1], 0  ;;  %s906_s24 = smov 0   ;;  %s908_s25 = smov 0  }
   0x2   :  { %s910_s26 = smov 0   ;;  %s912_s27 = smov 0  }
   0x3 LB: > { %s927_s28 = sadd.s32 4294967295, %s860_s27   ;;  %s642_s29 = sadd.s32 4294967294, %s860_s27   ;;  %s860_s27 = sphi %s912_s27, %s1102_s27   ;;  %s856_s26 = sphi %s910_s26, %s1101_s26   ;;  %s852_s25 = sphi %s908_s25, %s1100_s25   ;;  %s848_s24 = sphi %s906_s24, %s1099_s24  }
   0x4   : > { %s931_s30 = sadd.s32 1, %s860_s27   ;;  %s179_s8 = sadd.s32 1, %s856_s26 }
   0x5   : > { %s176_s9 = ssub.s32 %s860_s27, %s931_s30  ;;  %p189_p0 = scmp.ne.s32.totalorder %s856_s26, %s852_s25 }
   0x6   : > { %p177_p1 = scmp.eq.s32.totalorder %s176_s9, 0  ;;  %p190_p2 = scmp.eq.s32.totalorder %s927_s28, 1 }
   0x7   : > { %p195_p3 = scmp.ne.s32.totalorder %s852_s25, %s848_s24  ;;  %p196_p4 = scmp.eq.s32.totalorder %s642_s29, 1 }
   0x8   : > { %s942_s10 = scalar_select %p177_p1, %s856_s26, %s179_s8  }
   0x9   : > { %p944_p5 = por %p190_p2, %p189_p0  ;;  %p948_p6 = por %p196_p4, %p195_p3 }
   0xa   : > { %p645_p7 = scmp.ge.s32.totalorder %s860_s27, 1  ;;  %p239_p8 = scmp.lt.s32.totalorder %s860_s27, 3 }
   0xc   : > { %p240_p9 = pnand %p645_p7, %p239_p8 }
   0xd   : > { %v276_v0 = vld [vmem:[%s1090_s1] sm:$0xf] (!%p240_p9)  ;;  %vm281_vm0 = vcmask (!%p240_p9), 1043456   ;;  %p270_p10 = scmp.lt.s32.totalorder (!%p240_p9), %s927_s28, 1  ;;  %v862_v1 = vmov (!%p240_p9), 0.0   ;;  %vm863_vm1 = vmmov (!%p240_p9), 0   ;;  %v330_v18 = vlaneseq (!%p240_p9) }
   0xe   : > { %243 = sbr.rel (%p240_p9) target bundleno = 718 (0x2ce), region = 48  ;;  %690 = vmatprep.subr.bf16.mxu0 (!%p240_p9), %v862_v1  ;;  %v283_v2 = vsel (!%p240_p9), %vm281_vm0, %v276_v0, 0  ;;  %692 = vmatprep.mubr.msk.bf16.mxu0 (!%p240_p9), %vm863_vm1, %v862_v1  ;;  %v778_v3 = vld [vmem:[%s1092_s3] sm:$0xff] (!%p240_p9)   ;;  %vm277_vm2 = vcmask (!%p240_p9), 64512   ;;  %v779_v4 = vld [vmem:[%s1092_s3 + $0x8] sm:$0xff] (!%p240_p9)   ;;  %v780_v6 = vld [vmem:[%s1092_s3 + $0x10] sm:$0xff] (!%p240_p9)  }
   0xf   : > { %691 = vmatpush3.bf16.msra.mxu0 (!%p240_p9), %v283_v2  ;;  %696 = vmatprep.subr.bf16.mxu1 (!%p240_p9), %v862_v1  ;;  %v781_v7 = vld [vmem:[%s1092_s3 + $0x18] sm:$0xff] (!%p240_p9)   ;;  %v782_v8 = vld [vmem:[%s1092_s3 + $0x20] sm:$0xff] (!%p240_p9)   ;;  %v783_v9 = vld [vmem:[%s1092_s3 + $0x28] sm:$0xff] (!%p240_p9)   ;;  %v331_v19 = vshrl.u32 (!%p240_p9), %v330_v18, 7  ;;  %v864_v30 = vmov (!%p240_p9), 0   ;;  %s267_s16 = sand.u32 (!%p240_p9), 1, %s852_s25  }
  0x10   : > { %712 = vmatprep.mubr.msk.bf16.mxu1 (!%p240_p9), %vm863_vm1, %v862_v1  ;;  %716 = vmatprep.subr.bf16.mxu0 (!%p240_p9), %v862_v1  ;;  %v784_v10 = vld [vmem:[%s1092_s3 + $0x30] sm:$0xff] (!%p240_p9)   ;;  %v785_v11 = vld [vmem:[%s1092_s3 + $0x38] sm:$0xff] (!%p240_p9)   ;;  %v786_v12 = vld [vmem:[%s1094_s5] sm:$0xff] (!%p240_p9)   ;;  %s646_s17 = sshll.u32 (!%p240_p9), %s267_s16, 3  ;;  %vm567_vm3 = vcmask (!%p240_p9), 130048   ;;  %s570_s29 = scalar_lea.sflag (!%p240_p9), [#allocation3], %s267_s16 }
  0x11   : > { %697 = vmatpush3.bf16.msra.mxu1 (!%p240_p9), %v778_v3  ;;  %v787_v13 = vld [vmem:[%s1094_s5 + $0x8] sm:$0xff] (!%p240_p9)   ;;  %v788_v14 = vld [vmem:[%s1094_s5 + $0x10] sm:$0xff] (!%p240_p9)   ;;  %v789_v15 = vld [vmem:[%s1094_s5 + $0x18] sm:$0xff] (!%p240_p9)   ;;  %v332_v22 = vsub.s32 (!%p240_p9), 0, %v331_v19  ;;  %s269_s19 = scalar_lea.vmem (!%p240_p9), [#allocation2], %s646_s17 }
  0x12   : > { %698 = vmatprep.subr.bf16.mxu1 (!%p240_p9), %v862_v1  ;;  %v790_v16 = vld [vmem:[%s1094_s5 + $0x20] sm:$0xff] (!%p240_p9)   ;;  %v791_v17 = vld [vmem:[%s1094_s5 + $0x28] sm:$0xff] (!%p240_p9)   ;;  %v792_v32 = vld [vmem:[%s1094_s5 + $0x30] sm:$0xff] (!%p240_p9)   ;;  %s583_s20 = sshll.u32 (!%p240_p9), %s269_s19, 4  ;;  %s1049_s20 = int_to_ptr.vmem [resolvable:$true] %s583_s20 }
  0x13   : > { %v326_v20 = vld [vmem:[%s1091_s2] sm:$0x1] (!%p240_p9)  ;;  %v793_v33 = vld [vmem:[%s1094_s5 + $0x38] sm:$0xff] (!%p240_p9)   ;;  %s798_s8 = scalar_lea.vmem (!%p240_p9), %s1049_s20, 128 }
  0x14   : > { %v328_v21 = vpack.i.b16 (!%p240_p9), %v326_v20, %v326_v20  ;;  %v441_v34 = vld [vmem:[%s1093_s4] sm:$0x1] (!%p240_p9)  ;;  %p799_p11 = scmp.ne.s32.totalorder (!%p240_p9), %s1049_s20, %s798_s8 }
  0x15   : > { %s271_s15 = scalar_select %p270_p10, %s927_s28, 1  ;;  %699 = vmatpush3.bf16.msra.mxu1 %v779_v4  ;;  %v443_v35 = vpack.i.b16 %v441_v34, %v441_v34  ;;  %v657_v44 = vld [vmem:[%s1095_s6] ss:$0 sm:$0xff] }
  0x16   : > { %700 = vmatprep.subr.bf16.mxu1 %v862_v1  ;;  %v333_v23 = vrot.slane %v328_v21, %v332_v22  ;;  %p800_p12 = pnand %p799_p11, %p944_p5 }
  0x17   : > { %s647_s18 = sshll.u32 %s271_s15, 2  ;;  %v448_v36 = vrot.slane %v443_v35, %v332_v22 }
  0x18   : > { %s273_s23 = scalar_lea.vmem %s1089_s0, %s647_s18  ;;  %s667_s18 = sshll.u32 %s927_s28, 7 }
  0x19   : > { %v275_v5 = vld [vmem:[%s273_s23] sm:$0xf]  ;;  %701 = vmatpush3.bf16.msra.mxu1 %v780_v6  ;;  %s1047_s23 = scalar_lea.hbm %s1096_s7, %s667_s18  ;;  %p801_p13 = pneg %p800_p12 }
  0x1a   : > { %693 = vmatmul.mubr.msk.bf16.vlgmr.msra.gmra.mrb[0].mxu0 %vm277_vm2, %v275_v5  ;;  %702 = vmatprep.subr.bf16.mxu1 %v862_v1  ;;  %s865_s28 = smov [#allocation2]  }
  0x1b   : > { %732 = vmatprep.mubr.msk.bf16.mxu0 %vm863_vm1, %v862_v1  ;;  %717 = vmatpush3.bf16.msra.mxu0 %v786_v12  ;;  %s802_s9 = sshll.u32 %s865_s28, 4  ;;  %s803_s9 = int_to_ptr.vmem [resolvable:$false] %s802_s9 }
  0x1c   : > { %718 = vmatprep.subr.bf16.mxu0 %v862_v1  ;;  %s804_s13 = scalar_lea.vmem %s803_s9, 256  ;;  %p805_p0 = scmp.lt.s32.totalorder %s1049_s20, %s803_s9 }
  0x1d   : > { %703 = vmatpush3.bf16.msra.mxu1 %v781_v7  ;;  %p806_p1 = scmp.lt.s32.totalorder %s804_s13, %s798_s8 }
  0x1e   : > { %704 = vmatprep.subr.bf16.mxu1 %v862_v1 }
  0x1f   : > { %719 = vmatpush3.bf16.msra.mxu0 %v787_v13  ;;  %p807_p2 = por %p806_p1, %p805_p0 }
  0x20   : > { %720 = vmatprep.subr.bf16.mxu0 %v862_v1 }
  0x21   : > { %705 = vmatpush3.bf16.msra.mxu1 %v782_v8  ;;  %p808_p3 = pnand %p807_p2, %p801_p13 }
  0x22   : > { %706 = vmatprep.subr.bf16.mxu1 %v862_v1 }
  0x23   : > { %721 = vmatpush3.bf16.msra.mxu0 %v788_v14 }
  0x24   : > { %722 = vmatprep.subr.bf16.mxu0 %v862_v1 }
  0x25   : > { %707 = vmatpush3.bf16.msra.mxu1 %v783_v9 }
  0x26   : > { %708 = vmatprep.subr.bf16.mxu1 %v862_v1 }
  0x27   : > { %723 = vmatpush3.bf16.msra.mxu0 %v789_v15 }
  0x28   : > { %724 = vmatprep.subr.bf16.mxu0 %v862_v1 }
  0x29   : > { %709 = vmatpush3.bf16.msra.mxu1 %v784_v10 }
  0x2a   : > { %710 = vmatprep.subr.bf16.mxu1 %v862_v1 }
  0x2b   : > { %725 = vmatpush3.bf16.msra.mxu0 %v790_v16 }
  0x2c   : > { %726 = vmatprep.subr.bf16.mxu0 %v862_v1 }
  0x2d   : > { %711 = vmatpush3.bf16.msra.mxu1 %v785_v11 }
  0x2f   : > { %727 = vmatpush3.bf16.msra.mxu0 %v791_v17 }
  0x30   : > { %728 = vmatprep.subr.bf16.mxu0 %v862_v1 }
  0x33   : > { %729 = vmatpush3.bf16.msra.mxu0 %v792_v32 }
  0x34   : > { %730 = vmatprep.subr.bf16.mxu0 %v862_v1 }
  0x37   : > { %731 = vmatpush3.bf16.msra.mxu0 %v793_v33 }
  0xed   : > { %v319_v24 = vpop.f32.mrb[0].mxu0 }
  0xee   : > { %v325_v25 = vpack.c.bf16 %v319_v24, %v319_v24  ;;  %v694_v26 = vpop.f32.mrb[1].mxu0 }
  0xef   : > { %v322_v27 = vpop.f32.mrb[2].mxu0 }
  0xf0   : > { %v334_v28 = vadd.bf16 %v333_v23, %v325_v25  ;;  %v695_v29 = vpop.f32.mrb[3].mxu0 }
  0xf2   : > { %v335_v31 = vmax.bf16 %v864_v30, %v334_v28 }
  0xf4   : > { %713 = vmatmul.mubr.bf16.vlgmr.msra.gmra.mrb[0].mxu1 %v335_v31 }
 0x1c7   : > { %v434_v37 = vpop.f32.mrb[0].mxu1 }
 0x1c8   : > { %v440_v38 = vpack.c.bf16 %v434_v37, %v434_v37  ;;  %v714_v39 = vpop.f32.mrb[1].mxu1 }
 0x1c9   : > { %v437_v40 = vpop.f32.mrb[2].mxu1 }
 0x1ca   : > { %v449_v41 = vadd.bf16 %v448_v36, %v440_v38  ;;  %v715_v42 = vpop.f32.mrb[3].mxu1 }
 0x1cc   : > { %v450_v43 = vmax.bf16 %v864_v30, %v449_v41 }
 0x1ce   : > { %733 = vmatmul.mubr.bf16.vlgmr.msra.gmra.mrb[4].mxu0 %v450_v43 }
 0x2a1   : > { %v556_v45 = vpop.f32.mrb[4].mxu0 }
 0x2a2   : > { %v557_v46 = vadd.f32 %v657_v44, %v556_v45  ;;  %v734_v47 = vpop.f32.mrb[5].mxu0 }
 0x2a3   : > { %v559_v48 = vpop.f32.mrb[6].mxu0 }
 0x2a4   : > { %v562_v49 = vsub.f32 0.0, %v557_v46  ;;  %v735_v50 = vpop.f32.mrb[7].mxu0 }
 0x2a6   : > { %v563_v51 = vmul.f32 1.442695, %v562_v49 }
 0x2a8   : > { %794 = vpow2.f32 %v563_v51 }
 0x2b2   : > { %v795_v52 = vpop.eup %794 }
 0x2b3   : > { %v565_v53 = vadd.f32 1.0, %v795_v52 }
 0x2b5   : > { %796 = vrcp.f32 %v565_v53 }
 0x2bf   : > { %v797_v54 = vpop.eup %796 }
 0x2c0   : > { %568 = vst.msk [vmem:[%s269_s19] sm:$0xff] %vm567_vm3, %v797_v54 }
 0x2c1   : > { %811 = shalt.err (!%p808_p3)
}
 0x2c2   : > { %s812_s14 = scalar_lea.hbm %s1047_s23, 128  ;;  %s816_s17 = scalar_lea.hbm %s1096_s7, 256 }
 0x2c3   : > { %p813_p4 = scmp.ne.s32.totalorder %s1047_s23, %s812_s14  ;;  %p817_p9 = scmp.lt.u32.totalorder %s1047_s23, %s1096_s7 }
 0x2c4   : > { %p818_p10 = scmp.lt.u32.totalorder %s816_s17, %s812_s14  ;;  %p820_p12 = scmp.lt.u32.totalorder %s812_s14, %s1047_s23 }
 0x2c5   : > { %p814_p7 = pnand %p813_p4, %p944_p5 }
 0x2c6   : > { %p819_p11 = por %p818_p10, %p817_p9 }
 0x2c7   : > { %p815_p8 = pneg %p814_p7 }
 0x2c8   : > { %p821_p13 = por %p820_p12, %p819_p11 }
 0x2ca   : > { %p822_p0 = pnand %p821_p13, %p815_p8 }
 0x2cc   : > { %825 = shalt.err (!%p822_p0)
}
 0x2cd   : > { %736 = dma.vmem_to_hbm [thread:$0]  (%p944_p5), %s1049_s20, 128, %s1047_s23, %s570_s29  }
 0x2ce PF: > { %p742_p1 = scmp.ge.s32.totalorder %s860_s27, 2  ;;  %s595_s21 = sand.u32 1, %s848_s24  }
 0x2cf   : > { %s596_s22 = scalar_lea.sflag [#allocation3], %s595_s21 }
 0x2d0   : > { %p739_p2 = pnand %p742_p1, %p948_p6 }
 0x2d2   : > { %843 = dma.done.wait (!%p739_p2), %s596_s22, 128  }
 0x2d3   : > { %845 = vsyncadd (!%p739_p2), %s596_s22, 4294967168  ;;  %p17_p3 = scmp.ge.s32.totalorder %s931_s30, 4   ;;  %s1099_s24 = smov %s852_s25 }
 0x2d4   : > { %s1100_s25 = smov %s856_s26  ;;  %s1101_s26 = smov %s942_s10 }
 0x2d5   : > { %s1102_s27 = smov %s931_s30  ;;  %19 = sbr.rel (!%p17_p3) target bundleno = 3 (0x3), region = 83 }
 0x2dc   :  { %601 = vsyncpa [#allocation3], 1 }
 0x2dd   :  { %603 = vsyncpa [#allocation3 + $0x1], 1 }

</bundles_post_ra>
